<compile_context>
chip_gen: v7x
topology: tpu7x:2x2x1
jax: 0.10.0
libtpu: 0.0.40
codegen_flags: <defaults>
</compile_context>

<pallas_src>
import functools

import jax
import jax.numpy as jnp
from jax import lax
from jax.experimental import pallas as pl
from jax.experimental.pallas import tpu as pltpu


def _baseline_kernel(emb_ref, w_ref, b_ref, labels_ref,
                     logits_ref, nll_ref, acc_ref, *, seq_len):
    # emb_ref   : [bt, st, D] bf16 (VMEM, pipelined over the seq grid axis)
    # w_ref     : [D, L]      f32  (resident: same block index every step)
    # b_ref     : [1, L]      f32  (resident)
    # labels_ref: [bt, 1]     i32
    # logits_ref: [bt, L]     f32 out -- log_softmax(classifier(mean_pool))
    # nll_ref   : [bt, 1]     f32 out -- per-sample CE loss term
    # acc_ref   : [bt, D]     f32 VMEM scratch (running seq-sum of the embeddings)
    s = pl.program_id(1)

    @pl.when(s == 0)
    def _init():
        acc_ref[...] = jnp.zeros_like(acc_ref)

    # Upcast immediately after load (v5e VPU/EUP have no bf16) and fold this seq
    # tile into the pooled sum.  Per-step work is a single reduce-add; the tiny
    # classifier matmul is deferred to finalize.
    emb = emb_ref[...].astype(jnp.float32)                     # [bt, st, D]
    acc_ref[...] += jnp.sum(emb, axis=1)                       # [bt, D]

    @pl.when(s == pl.num_programs(1) - 1)
    def _finalize():
        pooled = acc_ref[...] * (1.0 / seq_len)                # mean pool  [bt, D]
        raw = jnp.dot(pooled, w_ref[...],
                      preferred_element_type=jnp.float32) + b_ref[...]   # [bt, L]
        m = jnp.max(raw, axis=-1, keepdims=True)
        lse = jnp.log(jnp.sum(jnp.exp(raw - m), axis=-1, keepdims=True)) + m
        logp = raw - lse
        logits_ref[...] = logp
        # CrossEntropyLoss's internal log_softmax is an exact identity on logp,
        # so the NLL is taken directly on logp.
        labels = labels_ref[...]                               # [bt, 1] i32
        cls = lax.broadcasted_iota(jnp.int32, logp.shape, 1)
        one_hot = (cls == labels).astype(jnp.float32)
        nll_ref[...] = -jnp.sum(one_hot * logp, axis=-1, keepdims=True)


def _pick_tile(total, cap, align=8):
    """Largest multiple-of-`align` divisor of `total` that is <= cap; falls back to
    the full extent (always layout-legal) if no aligned divisor exists."""
    cap = min(total, max(1, cap))
    if total <= cap:
        return total
    for t in range(cap - cap % align, 0, -align):
        if total % t == 0:
            return t
    return total


def baseline_model_forward(embbed, weight, bias, labels, *,
                           batch_tile=None, seq_tile=None):
    """embbed: [B,S,D] float; weight: [D,L] f32 (transposed vs nn.Linear [L,D]);
    bias: [L] f32; labels: [B] int."""
    B, S, D = embbed.shape
    L = weight.shape[1]

    # bf16 feed: halves the bytes on the bandwidth-bound embedding read.
    emb = embbed.astype(jnp.bfloat16)
    w = weight.astype(jnp.float32)
    bias2d = bias.astype(jnp.float32).reshape(1, L)
    labels2d = labels.astype(jnp.int32).reshape(B, 1)

    if batch_tile is None:
        batch_tile = _pick_tile(B, 8)
    if seq_tile is None:
        # ~8 MiB per bf16 embedding tile (16 MiB double-buffered): big enough to
        # amortize per-grid-step overhead at large S, small enough for every chip
        # once the scoped VMEM limit is raised to 32 MiB below.
        budget_bytes = 8 * 1024 * 1024
        st_cap = max(8, budget_bytes // (batch_tile * D * 2))
        seq_tile = _pick_tile(S, st_cap)
    assert B % batch_tile == 0 and S % seq_tile == 0

    grid = (B // batch_tile, S // seq_tile)
    kernel = functools.partial(_baseline_kernel, seq_len=S)

    logits, nll = pl.pallas_call(
        kernel,
        out_shape=(
            jax.ShapeDtypeStruct((B, L), jnp.float32),   # log_softmax(logits)
            jax.ShapeDtypeStruct((B, 1), jnp.float32),   # per-sample NLL
        ),
        grid_spec=pltpu.PrefetchScalarGridSpec(
            num_scalar_prefetch=0,
            grid=grid,
            in_specs=[
                pl.BlockSpec((batch_tile, seq_tile, D), lambda b, s: (b, s, 0)),
                pl.BlockSpec((D, L), lambda b, s: (0, 0)),
                pl.BlockSpec((1, L), lambda b, s: (0, 0)),
                pl.BlockSpec((batch_tile, 1), lambda b, s: (b, 0)),
            ],
            out_specs=(
                pl.BlockSpec((batch_tile, L), lambda b, s: (b, 0)),
                pl.BlockSpec((batch_tile, 1), lambda b, s: (b, 0)),
            ),
            scratch_shapes=[pltpu.VMEM((batch_tile, D), jnp.float32)],
        ),
        compiler_params=pltpu.CompilerParams(
            dimension_semantics=("parallel", "arbitrary"),
            vmem_limit_bytes=32 * 1024 * 1024,
        ),
    )(emb, w, bias2d, labels2d)

    # CrossEntropyLoss (mean reduction) == mean of the per-sample NLL terms.
    loss = jnp.mean(nll)
    return {"logits": logits, "loss": loss}


def _reference(embbed, weight, bias, labels):
    # Match the kernel's bf16 input feed so tolerances stay tight.
    emb = embbed.astype(jnp.bfloat16).astype(jnp.float32)
    pooled = jnp.mean(emb, axis=1)
    raw = pooled @ weight + bias
    logp = jax.nn.log_softmax(raw, axis=-1)
    # CrossEntropyLoss's internal log_softmax is an identity on logp.
    loss = -jnp.mean(logp[jnp.arange(embbed.shape[0]), labels])
    return logp, loss


def _make_inputs(key, B, S, D, L):
    k_emb, k_w, k_b, k_lab = jax.random.split(key, 4)
    embbed = jax.random.normal(k_emb, (B, S, D), dtype=jnp.float32)
    weight = jax.random.normal(k_w, (D, L), dtype=jnp.float32) * 0.05   # nn.Linear W^T
    bias = jax.random.normal(k_b, (L,), dtype=jnp.float32) * 0.05
    labels = jax.random.randint(k_lab, (B,), 0, L, dtype=jnp.int32)
    return embbed, weight, bias, labels


if __name__ == "__main__":
    key = jax.random.PRNGKey(0)
    k1, k2 = jax.random.split(key)

    # Test 1: small shapes consistent with the module (batch=2, seq=16,
    # intermediate_dims = 32, num_labels = 4); seq_tile=8 exercises a 2-step
    # pipelined reduction over the seq grid axis.
    embbed, weight, bias, labels = _make_inputs(k1, 2, 16, 32, 4)
    out = baseline_model_forward(embbed, weight, bias, labels,
                                 batch_tile=2, seq_tile=8)
    logits = jax.block_until_ready(out["logits"])
    loss = jax.block_until_ready(out["loss"])
    ref_logits, ref_loss = _reference(embbed, weight, bias, labels)
    assert jnp.allclose(logits, ref_logits, atol=1e-4), "logits mismatch (test 1)"
    assert jnp.allclose(loss, ref_loss, atol=1e-4), "loss mismatch (test 1)"

    # Test 2: default (auto) tiling path on slightly larger shapes.
    embbed, weight, bias, labels = _make_inputs(k2, 8, 128, 256, 4)
    out = baseline_model_forward(embbed, weight, bias, labels)
    logits = jax.block_until_ready(out["logits"])
    loss = jax.block_until_ready(out["loss"])
    ref_logits, ref_loss = _reference(embbed, weight, bias, labels)
    assert jnp.allclose(logits, ref_logits, atol=1e-4), "logits mismatch (test 2)"
    assert jnp.allclose(loss, ref_loss, atol=1e-4), "loss mismatch (test 2)"

    print("KERNEL_OK")
</pallas_src>

<mosaic_0001>
module attributes {stable_mosaic.version = 11 : i64} {
  func.func @_baseline_kernel(%arg0: i32, %arg1: i32, %arg2: memref<2x8x32xbf16, #tpu.memory_space<vmem>>, %arg3: memref<32x4xf32, #tpu.memory_space<vmem>>, %arg4: memref<1x4xf32, #tpu.memory_space<vmem>>, %arg5: memref<2x1xi32, #tpu.memory_space<vmem>>, %arg6: memref<2x4xf32, #tpu.memory_space<vmem>>, %arg7: memref<2x1xf32, #tpu.memory_space<vmem>>, %arg8: memref<2x32xf32, #tpu.memory_space<vmem>>) attributes {dimension_semantics = [#tpu.dimension_semantics<parallel>, #tpu.dimension_semantics<arbitrary>], iteration_bounds = array<i64: 1, 2>, scalar_prefetch = 0 : i64, scratch_operands = 1 : i64, tpu.core_type = #tpu.core_type<tc>, window_params = [{transform_indices = @transform_0, window_bounds = array<i64: 2, 8, 32>}, {pipeline_mode = #tpu.pipeline_mode<synchronous>, transform_indices = @transform_1, window_bounds = array<i64: 32, 4>}, {pipeline_mode = #tpu.pipeline_mode<synchronous>, transform_indices = @transform_2, window_bounds = array<i64: 1, 4>}, {transform_indices = @transform_3, window_bounds = array<i64: 2, 1>}, {transform_indices = @transform_4, window_bounds = array<i64: 2, 4>}, {transform_indices = @transform_5, window_bounds = array<i64: 2, 1>}]} {
    %c0_i32 = arith.constant 0 : i32
    %0 = arith.cmpi eq, %arg1, %c0_i32 : i32
    %1 = arith.extui %0 : i1 to i32
    %c0_i32_0 = arith.constant 0 : i32
    %2 = arith.cmpi ne, %1, %c0_i32_0 : i32
    scf.if %2 {
      %cst_8 = arith.constant 0.000000e+00 : f32
      %12 = vector.broadcast %cst_8 : f32 to vector<2x32xf32>
      %c0_9 = arith.constant 0 : index
      %c0_10 = arith.constant 0 : index
      %13 = vector.load %arg8[%c0_9, %c0_10] : memref<2x32xf32, #tpu.memory_space<vmem>>, vector<2x32xf32>
      tpu.vector_store %arg8[%c0_9, %c0_10], %12 {strides = array<i32>} : memref<2x32xf32, #tpu.memory_space<vmem>>, vector<2x32xf32>,
    } else {
    }
    %c0 = arith.constant 0 : index
    %c0_1 = arith.constant 0 : index
    %c0_2 = arith.constant 0 : index
    %3 = vector.load %arg2[%c0, %c0_1, %c0_2] : memref<2x8x32xbf16, #tpu.memory_space<vmem>>, vector<2x8x32xbf16>
    %4 = arith.extf %3 : vector<2x8x32xbf16> to vector<2x8x32xf32>
    %c0_3 = arith.constant 0 : index
    %c0_4 = arith.constant 0 : index
    %5 = vector.load %arg8[%c0_3, %c0_4] : memref<2x32xf32, #tpu.memory_space<vmem>>, vector<2x32xf32>
    %cst = arith.constant dense<0.000000e+00> : vector<2x32xf32>
    %6 = vector.multi_reduction <add>, %4, %cst [1] : vector<2x8x32xf32> to vector<2x32xf32>
    %7 = arith.addf %5, %6 : vector<2x32xf32>
    %c0_5 = arith.constant 0 : index
    %c0_6 = arith.constant 0 : index
    %8 = vector.load %arg8[%c0_5, %c0_6] : memref<2x32xf32, #tpu.memory_space<vmem>>, vector<2x32xf32>
    tpu.vector_store %arg8[%c0_5, %c0_6], %7 {strides = array<i32>} : memref<2x32xf32, #tpu.memory_space<vmem>>, vector<2x32xf32>,
    %c1_i32 = arith.constant 1 : i32
    %9 = arith.cmpi eq, %arg1, %c1_i32 : i32
    %10 = arith.extui %9 : i1 to i32
    %c0_i32_7 = arith.constant 0 : i32
    %11 = arith.cmpi ne, %10, %c0_i32_7 : i32
    scf.if %11 {
      %c0_8 = arith.constant 0 : index
      %c0_9 = arith.constant 0 : index
      %12 = vector.load %arg8[%c0_8, %c0_9] : memref<2x32xf32, #tpu.memory_space<vmem>>, vector<2x32xf32>
      %cst_10 = arith.constant 6.250000e-02 : f32
      %13 = vector.broadcast %cst_10 : f32 to vector<2x32xf32>
      %14 = arith.mulf %12, %13 : vector<2x32xf32>
      %c0_11 = arith.constant 0 : index
      %c0_12 = arith.constant 0 : index
      %15 = vector.load %arg3[%c0_11, %c0_12] : memref<32x4xf32, #tpu.memory_space<vmem>>, vector<32x4xf32>
      %cst_13 = arith.constant dense<0.000000e+00> : vector<2x4xf32>
      %16 = tpu.matmul %14, %15, %cst_13 {dimension_numbers = #tpu.dot_dimension_numbers<[1], [0], [0], [1], [0, 0, 1, 1], [], []>} : vector<2x32xf32>, vector<32x4xf32>, vector<2x4xf32> -> vector<2x4xf32>
      %c0_14 = arith.constant 0 : index
      %c0_15 = arith.constant 0 : index
      %17 = vector.load %arg4[%c0_14, %c0_15] : memref<1x4xf32, #tpu.memory_space<vmem>>, vector<1x4xf32>
      %18 = vector.broadcast %17 : vector<1x4xf32> to vector<2x4xf32>
      %19 = arith.addf %16, %18 : vector<2x4xf32>
      %cst_16 = arith.constant dense<0xFF800000> : vector<2xf32>
      %20 = vector.multi_reduction <maximumf>, %19, %cst_16 [1] : vector<2x4xf32> to vector<2xf32>
      %21 = vector.shape_cast %20 : vector<2xf32> to vector<2x1xf32>
      %22 = vector.broadcast %21 : vector<2x1xf32> to vector<2x4xf32>
      %23 = arith.subf %19, %22 : vector<2x4xf32>
      %24 = math.exp %23 : vector<2x4xf32>
      %cst_17 = arith.constant dense<0.000000e+00> : vector<2xf32>
      %25 = vector.multi_reduction <add>, %24, %cst_17 [1] : vector<2x4xf32> to vector<2xf32>
      %26 = vector.shape_cast %25 : vector<2xf32> to vector<2x1xf32>
      %27 = math.log %26 : vector<2x1xf32>
      %28 = arith.addf %27, %21 : vector<2x1xf32>
      %29 = vector.broadcast %28 : vector<2x1xf32> to vector<2x4xf32>
      %30 = arith.subf %19, %29 : vector<2x4xf32>
      %c0_18 = arith.constant 0 : index
      %c0_19 = arith.constant 0 : index
      %31 = vector.load %arg6[%c0_18, %c0_19] : memref<2x4xf32, #tpu.memory_space<vmem>>, vector<2x4xf32>
      tpu.vector_store %arg6[%c0_18, %c0_19], %30 {strides = array<i32>} : memref<2x4xf32, #tpu.memory_space<vmem>>, vector<2x4xf32>,
      %c0_20 = arith.constant 0 : index
      %c0_21 = arith.constant 0 : index
      %32 = vector.load %arg5[%c0_20, %c0_21] : memref<2x1xi32, #tpu.memory_space<vmem>>, vector<2x1xi32>
      %33 = tpu.iota {dimensions = array<i32: 1>} : vector<2x4xi32>
      %34 = vector.broadcast %32 : vector<2x1xi32> to vector<2x4xi32>
      %35 = arith.cmpi eq, %33, %34 : vector<2x4xi32>
      %36 = arith.extui %35 : vector<2x4xi1> to vector<2x4xi32>
      %37 = arith.sitofp %36 : vector<2x4xi32> to vector<2x4xf32>
      %38 = arith.mulf %37, %30 : vector<2x4xf32>
      %cst_22 = arith.constant dense<0.000000e+00> : vector<2xf32>
      %39 = vector.multi_reduction <add>, %38, %cst_22 [1] : vector<2x4xf32> to vector<2xf32>
      %40 = vector.shape_cast %39 : vector<2xf32> to vector<2x1xf32>
      %cst_23 = arith.constant 0.000000e+00 : f32
      %41 = vector.broadcast %cst_23 : f32 to vector<2x1xf32>
      %42 = arith.subf %41, %40 : vector<2x1xf32>
      %c0_24 = arith.constant 0 : index
      %c0_25 = arith.constant 0 : index
      %43 = vector.load %arg7[%c0_24, %c0_25] : memref<2x1xf32, #tpu.memory_space<vmem>>, vector<2x1xf32>
      tpu.vector_store %arg7[%c0_24, %c0_25], %42 {strides = array<i32>} : memref<2x1xf32, #tpu.memory_space<vmem>>, vector<2x1xf32>,
    } else {
    }
    return
  }
  func.func @transform_0(%arg0: i32, %arg1: i32) -> (i32, i32, i32) {
    %c0_i32 = arith.constant 0 : i32
    %c0_i32_0 = arith.constant 0 : i32
    return %arg0, %arg1, %c0_i32 : i32, i32, i32
  }
  func.func @transform_1(%arg0: i32, %arg1: i32) -> (i32, i32) {
    %c0_i32 = arith.constant 0 : i32
    %c0_i32_0 = arith.constant 0 : i32
    %c0_i32_1 = arith.constant 0 : i32
    return %c0_i32, %c0_i32_0 : i32, i32
  }
  func.func @transform_2(%arg0: i32, %arg1: i32) -> (i32, i32) {
    %c0_i32 = arith.constant 0 : i32
    %c0_i32_0 = arith.constant 0 : i32
    %c0_i32_1 = arith.constant 0 : i32
    return %c0_i32, %c0_i32_0 : i32, i32
  }
  func.func @transform_3(%arg0: i32, %arg1: i32) -> (i32, i32) {
    %c0_i32 = arith.constant 0 : i32
    %c0_i32_0 = arith.constant 0 : i32
    return %arg0, %c0_i32 : i32, i32
  }
  func.func @transform_4(%arg0: i32, %arg1: i32) -> (i32, i32) {
    %c0_i32 = arith.constant 0 : i32
    %c0_i32_0 = arith.constant 0 : i32
    return %arg0, %c0_i32 : i32, i32
  }
  func.func @transform_5(%arg0: i32, %arg1: i32) -> (i32, i32) {
    %c0_i32 = arith.constant 0 : i32
    %c0_i32_0 = arith.constant 0 : i32
    return %arg0, %c0_i32 : i32, i32
  }
}

</mosaic_0001>

<bundles_post_ra>
// kernel: tpu_custom_call.1
= control target key start
LH: loop header
LB: loop body
LE: loop exit
PB: predicated region body
PF: predicated region fallthrough
CT: control target
= control target key end

     0   :  { %11 = vsyncpa [#allocation5], 0  ;;  %s780_s18 = smov 0   ;;  %s782_s19 = smov 0   ;;  %s900_s0 = inlined_call_operand.vmem [shape: bf16[2,16,32], index: 0, kind: input, shape index: {}]   ;;  %s901_s1 = inlined_call_operand.vmem [shape: f32[32,4], index: 1, kind: input, shape index: {}]   ;;  %s902_s2 = inlined_call_operand.vmem [shape: f32[1,4], index: 2, kind: input, shape index: {}]   ;;  %s903_s3 = inlined_call_operand.vmem [shape: s32[2,1], index: 3, kind: input, shape index: {}]   ;;  %s904_s4 = inlined_call_operand.hbm [shape: f32[2,4], index: 4, kind: output, shape index: {0}]   ;;  %s905_s5 = inlined_call_operand.vmem [shape: f32[2,1], index: 5, kind: output, shape index: {1}]  }
   0x1   :  { %s784_s20 = smov 0   ;;  %s786_s21 = smov 0  }
   0x2   :  { %s788_s22 = smov 0  }
   0x3 LB: > { %s572_s23 = sadd.s32 4294967295, %s742_s22   ;;  %s26_s24 = sadd.s32 1, %s738_s21  ;;  %s742_s22 = sphi %s788_s22, %s17_s22   ;;  %s738_s21 = sphi %s786_s21, %s910_s21   ;;  %s734_s20 = sphi %s784_s20, %s909_s20   ;;  %s730_s19 = sphi %s782_s19, %s908_s19   ;;  %s726_s18 = sphi %s780_s18, %s907_s18  }
   0x4   : > { %p27_p0 = scmp.ge.s32.totalorder %s26_s24, 2  ;;  %p45_p1 = scmp.ne.s32.totalorder %s730_s19, %s726_s18 }
   0x5   : > { %p46_p2 = scmp.eq.s32.totalorder %s742_s22, 0  ;;  %s38_s26 = sadd.s32 1, %s730_s19 }
   0x6   : > { %s912_s24 = smov (%p27_p0, %s26_s24), 0  ;;  %p575_p5 = scmp.ge.s32.totalorder %s742_s22, 2 }
   0x7   : > { %p47_p3 = por %p46_p2, %p45_p1  ;;  %s34_s25 = ssub.s32 %s738_s21, %s912_s24 }
   0x8   : > { %p36_p4 = scmp.eq.s32.totalorder %s34_s25, 0  ;;  %204 = sbr.rel (%p575_p5) target bundleno = 22 (0x16), region = 28 }
   0xa   : > { %s816_s27 = scalar_select %p36_p4, %s730_s19, %s38_s26  }
   0xf   : > { %207 = sbr.rel (!%p47_p3) target bundleno = 22 (0x16), region = 32  ;;  %s209_s28 = sand.u32 (%p47_p3), 1, %s730_s19  }
  0x10   : > { %s577_s29 = sshll.u32 (%p47_p3), %s738_s21, 2  ;;  %s576_s30 = sshll.u32 (%p47_p3), %s209_s28, 3 }
  0x11   : > { %s216_s8 = scalar_lea.vmem (%p47_p3), %s900_s0, %s577_s29  ;;  %s211_s9 = scalar_lea.vmem (%p47_p3), [#allocation3], %s576_s30 }
  0x12   : > { %v232_v0 = vld [vmem:[%s216_s8] sm:$0xf] (%p47_p3)  ;;  %v234_v1 = vld [vmem:[%s216_s8 + $0x8] sm:$0xf] (%p47_p3) }
  0x13   : > { %233 = vst [vmem:[%s211_s9] sm:$0xf] (%p47_p3), %v232_v0  ;;  %235 = vst [vmem:[%s211_s9 + $0x4] sm:$0xf] (%p47_p3), %v234_v1 }
  0x16 PF: > { %p578_p6 = scmp.ge.s32.totalorder %s742_s22, 1  ;;  %p261_p7 = scmp.lt.s32.totalorder %s742_s22, 3 }
  0x18   : > { %p262_p8 = pnand %p578_p6, %p261_p7 }
  0x19   : > { %s268_s10 = sand.u32 (!%p262_p8), 1, %s726_s18   ;;  %p580_p9 = scmp.ne.s32.totalorder (!%p262_p8), %s734_s20, 0 }
  0x1a   : > { %265 = sbr.rel (%p262_p8) target bundleno = 774 (0x306), region = 73  ;;  %s579_s11 = sshll.u32 (!%p262_p8), %s268_s10, 3 }
  0x1b   : > { %s270_s12 = scalar_lea.vmem (!%p262_p8), [#allocation3], %s579_s11 }
  0x21   : > { %310 = sbr.rel (%p580_p9) target bundleno = 40 (0x28), region = 81  ;;  %vm311_vm0 = vcmask (!%p580_p9), 254976   ;;  %v744_v2 = vmov (!%p580_p9), 0.0  }
  0x22   : > { %312 = vst.msk [vmem:[#allocation2] sm:$0x3] (!%p580_p9), %vm311_vm0, %v744_v2 }
  0x28 PF: > { %v591_v3 = vld [vmem:[%s270_s12] sm:$0xff]   ;;  %vm318_vm1 = vcmask 261120   ;;  %vm335_vm2 = vcmask 1041409   ;;  %vm339_vm3 = vcmask 254976   ;;  %p581_p10 = scmp.ne.s32.totalorder %s734_s20, 1 }
  0x29   : > { %v592_v4 = vunpack.c.l.bf16 %v591_v3  ;;  %v593_v5 = vunpack.c.h.bf16 %v591_v3  ;;  %v317_v18 = vld [vmem:[#allocation2] sm:$0x3]  ;;  %v348_v24 = vld [vmem:[%s901_s1 + $0x8] sm:$0xff] (!%p581_p10)  ;;  %v349_v25 = vld [vmem:[%s901_s1 + $0x10] sm:$0xff] (!%p581_p10)  ;;  %v745_v26 = vmov (!%p581_p10), 0.0|0.0   ;;  %vm746_vm4 = vmmov (!%p581_p10), 0  }
  0x2a   : > { %v347_v23 = vld [vmem:[%s901_s1] sm:$0xff] (!%p581_p10)  ;;  %610 = vmatprep.subr.bf16.mxu0 (!%p581_p10), %v745_v26  ;;  %v350_v28 = vld [vmem:[%s901_s1 + $0x18] sm:$0xff] (!%p581_p10)  ;;  %v747_v29 = vmov (!%p581_p10), 0.0   ;;  %vm431_vm5 = vcmask (!%p581_p10), 25600   ;;  %v748_v39 = vmov (!%p581_p10), 0   ;;  %v447_v46 = vlaneseq (!%p581_p10) }
  0x2b   : > { %v319_v6 = vsel %vm318_vm1, %v592_v4, 0.0  ;;  %v326_v7 = vsel %vm318_vm1, %v593_v5, 0.0  ;;  %v611_v27 = vpack.c.bf16 (!%p581_p10), %v348_v24, %v347_v23  ;;  %607 = vmatprep.mubr.msk.f32.mxu0 (!%p581_p10), %vm746_vm4, %v747_v29  ;;  %v614_v30 = vpack.c.bf16 (!%p581_p10), %v350_v28, %v349_v25  ;;  %v582_v33 = vld [vmem:[%s902_s2] ss:$0 sm:$0xff] (!%p581_p10)  ;;  %668 = vset.pattern.permute.xlu1 (!%p581_p10), %v748_v39 }
  0x2c   : > { %v320_v8 = vrot.slane %v319_v6, 4  ;;  %v327_v9 = vrot.slane %v326_v7, 4  ;;  %v446_v38 = vld [vmem:[%s903_s3] sm:$0x3] (!%p581_p10)  ;;  %669 = vset.pattern.permute.xlu0 (!%p581_p10), %v748_v39  ;;  %v448_v47 = vand.u32 (!%p581_p10), 127, %v447_v46  ;;  %vm460_vm7 = vcmask (!%p581_p10), 1024  }
  0x2d   : > { %612 = vmatpush3.bf16.msra.mxu0 (!%p581_p10), %v611_v27  ;;  %450 = vperm.xlu1 (!%p581_p10), %668, %v446_v38  }
  0x2e   : > { %v321_v10 = vadd.f32 %v320_v8, %v319_v6  ;;  %v328_v11 = vadd.f32 %v327_v9, %v326_v7  ;;  %613 = vmatprep.subr.bf16.mxu0 (!%p581_p10), %v745_v26 }
  0x30   : > { %v322_v12 = vrot.slane %v321_v10, 2  ;;  %v329_v13 = vrot.slane %v328_v11, 2 }
  0x31   : > { %615 = vmatpush3.bf16.msra.mxu0 (!%p581_p10), %v614_v30 }
  0x32   : > { %v323_v14 = vadd.f32 %v322_v12, %v321_v10  ;;  %v330_v15 = vadd.f32 %v329_v13, %v328_v11 }
  0x34   : > { %v324_v16 = vrot.slane %v323_v14, 1  ;;  %v331_v17 = vrot.slane %v330_v15, 1 }
  0x35   : > { %344 = sbr.rel (%p581_p10) target bundleno = 749 (0x2ed), region = 85 }
  0x36   : > { %v325_v19 = vadd.f32 %v324_v16, %v323_v14  ;;  %v332_v20 = vadd.f32 %v331_v17, %v330_v15 }
  0x38   : > { %v336_v21 = vsel %vm335_vm2, %v332_v20, %v325_v19 }
  0x39   : > { %v338_v22 = vadd.f32 %v336_v21, %v317_v18 }
  0x3b   : > { %340 = vst.msk [vmem:[#allocation2] sm:$0x3] %vm339_vm3, %v338_v22 }
  0x42   : > { %v345_v31 = vld [vmem:[#allocation2] sm:$0x3] }
  0x43   : > { %v346_v32 = vmul.f32 0.0625, %v345_v31 }
  0x45   : > { %608 = vmatmul.mubr.msk.f32.vlgmr.msra.gmra.mrb[0].mxu0 %vm318_vm1, %v346_v32 }
  0xac   : > { %v451_v48 = vpop.permute.xlu1 %450 }
  0xad   : > { %vm452_vm6 = vcmp.eq.s32.totalorder %v448_v47, %v451_v48 }
  0xae   : > { %v584_v52 = vsel %vm452_vm6, 1.0, %v747_v29 }
 0x118   : > { %v427_v34 = vpop.f32.mrb[0].mxu0 }
 0x119   : > { %v428_v35 = vadd.f32 %v582_v33, %v427_v34  ;;  %v609_v36 = vpop.f32.mrb[1].mxu0 }
 0x11b   : > { %v432_v37 = vsel %vm431_vm5, %v428_v35, -inf }
 0x11c   : > { %433 = vmax.xlane.f32.xlu0 %v432_v37 }
 0x1a9   : > { %v434_v40 = vpop.xlane.xlu0 %433 }
 0x1aa   : > { %v435_v41 = vsub.f32 %v428_v35, %v434_v40 }
 0x1ac   : > { %v436_v42 = vmul.f32 1.442695, %v435_v41 }
 0x1ae   : > { %670 = vpow2.f32 %v436_v42 }
 0x1b8   : > { %v671_v43 = vpop.eup %670 }
 0x1b9   : > { %v438_v44 = vsel %vm431_vm5, %v671_v43, 0.0 }
 0x1ba   : > { %439 = vadd.xlane.f32.xlu0 %v438_v44 }
 0x247   : > { %v440_v45 = vpop.xlane.xlu0 %439 }
 0x248   : > { %672 = vlog2.f32 %v440_v45 }
 0x252   : > { %v673_v49 = vpop.eup %672 }
 0x253   : > { %v442_v50 = vmul.f32 0.6931472, %v673_v49 }
 0x255   : > { %v443_v51 = vadd.f32 %v442_v50, %v434_v40 }
 0x257   : > { %v444_v53 = vsub.f32 %v428_v35, %v443_v51 }
 0x259   : > { %v455_v54 = vmul.f32 %v584_v52, %v444_v53  ;;  %445 = vst.msk [vmem:[#allocation4] sm:$0x3] %vm431_vm5, %v444_v53 }
 0x25b   : > { %v456_v55 = vsel %vm431_vm5, %v455_v54, 0.0 }
 0x25c   : > { %457 = vadd.xlane.f32.xlu1 %v456_v55 }
 0x2e9   : > { %v458_v56 = vpop.xlane.xlu1 %457 }
 0x2ea   : > { %v459_v57 = vsub.f32 0.0, %v458_v56 }
 0x2ec   : > { %461 = vst.msk [vmem:[%s905_s5] sm:$0x3] %vm460_vm7, %v459_v57 }
 0x2ed PF: > { %p859_p11 = scmp.eq.s32.totalorder %s572_s23, 1  ;;  %s749_s9 = smov [#allocation4]  }
 0x2ee   : > { %s475_s10 = sshll.u32 %s749_s9, 4  ;;  %s476_s10 = int_to_ptr.vmem [resolvable:$true] %s475_s10 }
 0x2ef   : > { %s674_s11 = scalar_lea.vmem %s476_s10, 32  ;;  %p681_p1 = scmp.lt.s32.totalorder %s476_s10, %s476_s10 }
 0x2f0   : > { %p675_p12 = scmp.ne.s32.totalorder %s476_s10, %s674_s11  ;;  %p682_p2 = scmp.lt.s32.totalorder %s674_s11, %s674_s11 }
 0x2f2   : > { %p676_p13 = pnand %p675_p12, %p859_p11  ;;  %p683_p3 = por %p682_p2, %p681_p1 }
 0x2f4   : > { %p677_p0 = pneg %p676_p13 }
 0x2f6   : > { %p684_p4 = pnand %p683_p3, %p677_p0 }
 0x2f8   : > { %687 = shalt.err (!%p684_p4)
}
 0x2f9   : > { %s688_s23 = scalar_lea.hbm %s904_s4, 32 }
 0x2fa   : > { %p689_p5 = scmp.ne.s32.totalorder %s904_s4, %s688_s23  ;;  %p694_p8 = scmp.lt.u32.totalorder %s688_s23, %s904_s4 }
 0x2fc   : > { %p690_p6 = pnand %p689_p5, %p859_p11 }
 0x2fe   : > { %p691_p7 = pneg %p690_p6 }
 0x300   : > { %p696_p9 = pnand %p694_p8, %p691_p7 }
 0x302   : > { %699 = shalt.err (!%p696_p9)
}
 0x303   : > { %617 = dma.vmem_to_hbm [thread:$0]  (%p859_p11), %s476_s10, 32, %s904_s4, [#allocation5]  }
 0x304   : > { %721 = dma.done.wait (%p859_p11), [#allocation5], 32  }
 0x305   : > { %723 = vsyncadd (%p859_p11), [#allocation5], 4294967264 }
 0x306 PF: > { %s17_s22 = sadd.s32 1, %s742_s22   ;;  %s907_s18 = smov %s730_s19 }
 0x307   : > { %p14_p10 = scmp.ge.s32.totalorder %s17_s22, 4   ;;  %s908_s19 = smov %s816_s27 }
 0x308   : > { %s909_s20 = smov %s738_s21  ;;  %s910_s21 = smov %s912_s24 }
 0x309   :  { %16 = sbr.rel (!%p14_p10) target bundleno = 3 (0x3), region = 133 }
 0x310   :  { %498 = vsyncpa [#allocation5], 1 }
 0x311   :  { %500 = vsyncpa [#allocation5 + $0x1], 1 }

</bundles_post_ra>
